<compile_context>
chip_gen: v5e
topology: v5e:2x2
jax: 0.10.0
libtpu: 0.0.40
codegen_flags: <defaults>
</compile_context>

<pallas_src>
import functools

import jax
import jax.numpy as jnp
from jax.experimental import pallas as pl
from jax.experimental.pallas import tpu as pltpu

OUT_PAD = 128  # lane-dense padded output width (real output dim is 3)


def _round_up(x, m):
    return ((x + m - 1) // m) * m


def _choose_tiles(n):
    """Return (n_pad, tm, tk) with n_pad % tm == 0 and n_pad % tk == 0."""
    if n >= 1024:
        n_pad = _round_up(n, 1024)
        tk = 1024
        # Keep >=2 row tiles so the "parallel" i axis spans both v7x TCs.
        tm = 1024 if n_pad >= 2048 else 512
        return n_pad, tm, tk
    if n > 8:
        n_pad = _round_up(n, 16)
        return n_pad, n_pad // 2, n_pad   # 2 row tiles, single k step
    return 8, 8, 8


# --------------------------------------------------------------------------
# Kernel 1: fused-weight projection  Y = X @ Wc   (Wc = W_gnn.T @ W_fc.T)
# --------------------------------------------------------------------------
def project_kernel(x_ref, wc_ref, y_ref):
    y_ref[...] = jnp.dot(
        x_ref[...], wc_ref[...], preferred_element_type=jnp.float32
    ).astype(y_ref.dtype)


# --------------------------------------------------------------------------
# Kernel 2: mean aggregation + bias:  out = (A_counts @ Y) * inv_deg + bc
# Grid: (row tiles i [parallel], k reduction [arbitrary, last]).
# Y is VMEM-resident (constant block index); output block is the accumulator.
# --------------------------------------------------------------------------
def aggregate_kernel(a_ref, y_ref, invdeg_ref, bc_ref, o_ref, *, tk, compute_dtype):
    k = pl.program_id(1)

    start = pl.multiple_of(k * tk, 8)          # sublane-aligned slice of resident Y
    a = a_ref[...]
    y = y_ref[pl.ds(start, tk), :]
    if compute_dtype == jnp.bfloat16:          # v5e fast path: bf16 x bf16 on the MXU
        a = a.astype(jnp.bfloat16)
        y = y.astype(jnp.bfloat16)
    # Default path: A (bf16 counts) is promoted to f32 -> exact f32 matmul.
    contrib = jnp.dot(a, y, preferred_element_type=jnp.float32)

    @pl.when(k == 0)
    def _():
        o_ref[...] = contrib

    @pl.when(k != 0)
    def _():
        o_ref[...] += contrib

    @pl.when(k == pl.num_programs(1) - 1)
    def _():
        o_ref[...] = o_ref[...] * invdeg_ref[...] + bc_ref[...]


# --------------------------------------------------------------------------
# Wrapper
# --------------------------------------------------------------------------
def gnn_lstm_hybrid_forward(x, edge_index, params, *,
                            adj_dtype=jnp.bfloat16,
                            compute_dtype=jnp.float32):
    """x: [N, lstm_output_dim] float32; edge_index: [2, E] int32.

    adj_dtype:     dtype of the streamed in-edge count matrix. bf16 is exact
                   for counts <= 256 per (dst, src) pair and halves the
                   dominant O(N^2) HBM stream. Use f32 for multigraphs with
                   larger multiplicities.
    compute_dtype: f32 (default, bit-exact: bf16 counts are promoted before
                   the dot) or bf16 (v5e fast path — also downcasts Y, ~1e-3
                   relative error).
    """
    compute_dtype = jnp.dtype(compute_dtype)
    n, f = x.shape
    src, dst = edge_index[0], edge_index[1]

    # ---- algebraic fusion of the two Linear layers (exact: no nonlinearity) ----
    wc = params["w_gnn"].T @ params["w_fc"].T                   # [F, 3]
    bc = params["b_gnn"] @ params["w_fc"].T + params["b_fc"]    # [3]
    out_dim = wc.shape[1]

    n_pad, tm, tk = _choose_tiles(n)

    # ---- plain-JAX glue: padded inputs, edge counts (built directly in
    # adj_dtype — no extra O(N^2) conversion pass), 1/deg -----------------------
    x_p = jnp.zeros((n_pad, f), jnp.float32).at[:n].set(x.astype(jnp.float32))
    wc_p = jnp.zeros((f, OUT_PAD), jnp.float32).at[:, :out_dim].set(wc)
    bc_p = jnp.zeros((1, OUT_PAD), jnp.float32).at[0, :out_dim].set(bc)

    adj = jnp.zeros((n_pad, n_pad), adj_dtype).at[dst, src].add(1.0)
    deg = jnp.zeros((n_pad,), jnp.float32).at[dst].add(1.0)
    inv_deg = jnp.where(deg > 0, 1.0 / jnp.maximum(deg, 1.0), 0.0)[:, None]  # [n_pad,1]

    y_dtype = jnp.bfloat16 if compute_dtype == jnp.bfloat16 else jnp.float32

    # ---- Pallas call 1: Y = X @ Wc (row-tiled, runs once) ----------------------
    y = pl.pallas_call(
        project_kernel,
        out_shape=jax.ShapeDtypeStruct((n_pad, OUT_PAD), y_dtype),
        grid_spec=pltpu.PrefetchScalarGridSpec(
            num_scalar_prefetch=0,
            grid=(n_pad // tm,),
            in_specs=[
                pl.BlockSpec((tm, f), lambda i: (i, 0)),          # X rows
                pl.BlockSpec((f, OUT_PAD), lambda i: (0, 0)),     # fused weights
            ],
            out_specs=pl.BlockSpec((tm, OUT_PAD), lambda i: (i, 0)),
        ),
        compiler_params=pltpu.CompilerParams(dimension_semantics=("parallel",)),
    )(x_p, wc_p)

    # ---- Pallas call 2: out = (A @ Y) * inv_deg + bc ---------------------------
    grid = (n_pad // tm, n_pad // tk)
    n_k = n_pad // tk

    # Deeper prefetch on the only large streamed operand (A) when the reduction
    # is deep enough to benefit; costs one extra A tile of VMEM.
    if n_k >= 3:
        a_spec = pl.BlockSpec((tm, tk), lambda i, k: (i, k),
                              pipeline_mode=pl.Buffered(3))
    else:
        a_spec = pl.BlockSpec((tm, tk), lambda i, k: (i, k))

    out_padded = pl.pallas_call(
        functools.partial(aggregate_kernel, tk=tk, compute_dtype=compute_dtype),
        out_shape=jax.ShapeDtypeStruct((n_pad, OUT_PAD), jnp.float32),
        grid_spec=pltpu.PrefetchScalarGridSpec(
            num_scalar_prefetch=0,
            grid=grid,
            in_specs=[
                a_spec,                                              # A counts tile
                # Resident Y: constant block index -> DMA'd once, kept in VMEM.
                # (n_pad*128*4 B = 4 MiB at n_pad=8192; for n_pad >~ 30k on v7x
                # switch to bf16 Y or a per-k-tiled Y BlockSpec.)
                pl.BlockSpec((n_pad, OUT_PAD), lambda i, k: (0, 0)),
                pl.BlockSpec((tm, 1), lambda i, k: (i, 0)),          # 1/deg per dst row
                pl.BlockSpec((1, OUT_PAD), lambda i, k: (0, 0)),     # fused bias
            ],
            out_specs=pl.BlockSpec((tm, OUT_PAD), lambda i, k: (i, 0)),
        ),
        compiler_params=pltpu.CompilerParams(
            # Row tiles independent (megacore-shardable); k is the reduction
            # axis, kept last / arbitrary.
            dimension_semantics=("parallel", "arbitrary"),
        ),
    )(adj, y, inv_deg, bc_p)

    return out_padded[:n, :out_dim]


# --------------------------------------------------------------------------
# Params / reference
# --------------------------------------------------------------------------
def init_params(key, lstm_output_dim, gnn_hidden_dim):
    k1, k2, k3, k4 = jax.random.split(key, 4)
    s1 = 1.0 / jnp.sqrt(lstm_output_dim)
    s2 = 1.0 / jnp.sqrt(gnn_hidden_dim)
    return {
        "w_gnn": jax.random.uniform(k1, (gnn_hidden_dim, lstm_output_dim),
                                    jnp.float32, -s1, s1),
        "b_gnn": jax.random.uniform(k2, (gnn_hidden_dim,), jnp.float32, -s1, s1),
        "w_fc": jax.random.uniform(k3, (3, gnn_hidden_dim), jnp.float32, -s2, s2),
        "b_fc": jax.random.uniform(k4, (3,), jnp.float32, -s2, s2),
    }


def reference_forward(x, edge_index, params):
    # Pure-JAX reference matching PyTorch / PyG semantics (unfused).
    n = x.shape[0]
    src, dst = edge_index[0], edge_index[1]
    adj = jnp.zeros((n, n), dtype=jnp.float32).at[dst, src].add(1.0)
    deg = jnp.sum(adj, axis=1, keepdims=True)
    adj = jnp.where(deg > 0, adj / jnp.maximum(deg, 1.0), 0.0)
    aggr = adj @ x
    h = aggr @ params["w_gnn"].T + params["b_gnn"]
    return h @ params["w_fc"].T + params["b_fc"]


if __name__ == "__main__":
    key = jax.random.PRNGKey(0)
    kx, kp, kx2 = jax.random.split(key, 3)

    # ---- primary example: the module's 4-node ring graph ----------------------
    num_nodes = 4
    lstm_output_dim = 32
    gnn_hidden_dim = 32
    edge_index = jnp.array([[0, 1, 2, 3], [1, 2, 3, 0]], dtype=jnp.int32)

    x = jax.random.normal(kx, (num_nodes, lstm_output_dim), dtype=jnp.float32)
    params = init_params(kp, lstm_output_dim, gnn_hidden_dim)

    out = gnn_lstm_hybrid_forward(x, edge_index, params)
    out = jax.block_until_ready(out)
    ref = reference_forward(x, edge_index, params)
    assert out.shape == (num_nodes, 3)
    assert jnp.allclose(out, ref, atol=1e-4, rtol=1e-4)

    # ---- secondary check: exercises the >=2-row-tile (megacore) path ----------
    n2 = 40
    ring2 = jnp.stack([jnp.arange(n2, dtype=jnp.int32),
                       (jnp.arange(n2, dtype=jnp.int32) + 1) % n2])
    x2 = jax.random.normal(kx2, (n2, lstm_output_dim), dtype=jnp.float32)
    out2 = jax.block_until_ready(gnn_lstm_hybrid_forward(x2, ring2, params))
    ref2 = reference_forward(x2, ring2, params)
    assert out2.shape == (n2, 3)
    assert jnp.allclose(out2, ref2, atol=1e-4, rtol=1e-4)

    print("KERNEL_OK")
</pallas_src>

<mosaic_0001>
module attributes {stable_mosaic.version = 11 : i64} {
  func.func @project_kernel(%arg0: i32, %arg1: memref<8x32xf32, #tpu.memory_space<vmem>>, %arg2: memref<32x128xf32, #tpu.memory_space<vmem>>, %arg3: memref<8x128xf32, #tpu.memory_space<vmem>>) attributes {dimension_semantics = [#tpu.dimension_semantics<parallel>], iteration_bounds = array<i64: 1>, scalar_prefetch = 0 : i64, scratch_operands = 0 : i64, tpu.core_type = #tpu.core_type<tc>, window_params = [{transform_indices = @transform_0, window_bounds = array<i64: 8, 32>}, {pipeline_mode = #tpu.pipeline_mode<synchronous>, transform_indices = @transform_1, window_bounds = array<i64: 32, 128>}, {transform_indices = @transform_2, window_bounds = array<i64: 8, 128>}]} {
    %c0 = arith.constant 0 : index
    %c0_0 = arith.constant 0 : index
    %0 = vector.load %arg1[%c0, %c0_0] : memref<8x32xf32, #tpu.memory_space<vmem>>, vector<8x32xf32>
    %c0_1 = arith.constant 0 : index
    %c0_2 = arith.constant 0 : index
    %1 = vector.load %arg2[%c0_1, %c0_2] : memref<32x128xf32, #tpu.memory_space<vmem>>, vector<32x128xf32>
    %cst = arith.constant dense<0.000000e+00> : vector<8x128xf32>
    %2 = tpu.matmul %0, %1, %cst {dimension_numbers = #tpu.dot_dimension_numbers<[1], [0], [0], [1], [0, 0, 1, 1], [], []>} : vector<8x32xf32>, vector<32x128xf32>, vector<8x128xf32> -> vector<8x128xf32>
    %c0_3 = arith.constant 0 : index
    %c0_4 = arith.constant 0 : index
    %3 = vector.load %arg3[%c0_3, %c0_4] : memref<8x128xf32, #tpu.memory_space<vmem>>, vector<8x128xf32>
    tpu.vector_store %arg3[%c0_3, %c0_4], %2 {strides = array<i32>} : memref<8x128xf32, #tpu.memory_space<vmem>>, vector<8x128xf32>,
    return
  }
  func.func @transform_0(%arg0: i32) -> (i32, i32) {
    %c0_i32 = arith.constant 0 : i32
    %c0_i32_0 = arith.constant 0 : i32
    return %arg0, %c0_i32 : i32, i32
  }
  func.func @transform_1(%arg0: i32) -> (i32, i32) {
    %c0_i32 = arith.constant 0 : i32
    %c0_i32_0 = arith.constant 0 : i32
    %c0_i32_1 = arith.constant 0 : i32
    return %c0_i32, %c0_i32_0 : i32, i32
  }
  func.func @transform_2(%arg0: i32) -> (i32, i32) {
    %c0_i32 = arith.constant 0 : i32
    %c0_i32_0 = arith.constant 0 : i32
    return %arg0, %c0_i32 : i32, i32
  }
}

</mosaic_0001>

<bundles_post_ra>
// kernel: tpu_custom_call.1
= control target key start
LH: loop header
LB: loop body
LE: loop exit
PB: predicated region body
PF: predicated region fallthrough
CT: control target
= control target key end

     0   :  { %7 = vsyncpa [#allocation3], 0  ;;  %s203_s0 = inlined_call_operand.hbm [shape: f32[8,32], index: 0, kind: input, shape index: {}]   ;;  %s204_s1 = inlined_call_operand.hbm [shape: f32[32,128], index: 1, kind: input, shape index: {}]   ;;  %s205_s2 = inlined_call_operand.hbm [shape: f32[8,128], index: 2, kind: output, shape index: {}]  }
   0x1   :  { %8 = vsyncpa [#allocation6], 0 }
   0x2   :  { %9 = vsyncpa [#allocation4], 0  ;;  %s15_s11 = sshll.u32 %s203_s0, 4  ;;  %s174_s12 = smov [#allocation2]   ;;  %s16_s11 = int_to_ptr.hbm [resolvable:$true] %s15_s11 }
   0x3   :  { %s17_s13 = sshll.u32 %s174_s12, 4  ;;  %s25_s16 = sshll.u32 %s204_s1, 4  ;;  %s18_s13 = int_to_ptr.vmem [resolvable:$true] %s17_s13  ;;  %s26_s16 = int_to_ptr.hbm [resolvable:$true] %s25_s16 }
   0x4   :  { %20 = dma.hbm_to_vmem [thread:$0]  %s16_s11, 128, %s18_s13, [#allocation3]  }
   0x5   :  { %s175_s17 = smov [#allocation5]   ;;  %s176_s19 = smov 128  }
   0x6   :  { %s27_s18 = sshll.u32 %s175_s17, 4  ;;  %s177_s20 = smov 8   ;;  %s28_s18 = int_to_ptr.vmem [resolvable:$true] %s27_s18 }
   0x7   :  { %33 = dma.hbm_to_vmem [thread:$0]  %s26_s16, 512, %s28_s18, [#allocation6], %s176_s19, %s176_s19, %s177_s20  }
   0x8   :  { %168 = dma.done.wait [#allocation3], 128  }
   0x9   :  { %169 = vsyncadd [#allocation3], 4294967168 }
   0xa   :  { %170 = dma.done.wait [#allocation6], 512  }
   0xb   :  { %171 = vsyncadd [#allocation6], 4294966784  ;;  %v46_v0 = vld [vmem:[#allocation5 + $0x18] sm:$0xff]  ;;  %v45_v1 = vld [vmem:[#allocation5 + $0x10] sm:$0xff]  ;;  %vm47_vm0 = vcmask 261120   ;;  %s178_s0 = smov [#allocation7]  }
   0xc   :  { %63 = vmatpush.msra.mxu0 %v46_v0  ;;  %v44_v2 = vld [vmem:[#allocation5 + $0x8] sm:$0xff]  ;;  %v43_v3 = vld [vmem:[#allocation5] sm:$0xff]  ;;  %v42_v4 = vld [vmem:[#allocation2] sm:$0xff]  ;;  %s77_s1 = sshll.u32 %s178_s0, 4  ;;  %s79_s23 = sshll.u32 %s205_s2, 4  ;;  %s78_s1 = int_to_ptr.vmem [resolvable:$true] %s77_s1  ;;  %s80_s23 = int_to_ptr.hbm [resolvable:$true] %s79_s23 }
   0xe   :  { %64 = vmatpush.msra.mxu0 %v45_v1 }
  0x10   :  { %65 = vmatpush.msra.mxu0 %v44_v2 }
  0x12   :  { %66 = vmatpush.msra.mxu0 %v43_v3 }
  0x13   :  { %90 = vmatmul.msk.f32.vlgmr.msra.gmra.mxu0 %vm47_vm0, %v42_v4 }
  0x90   :  { %v68_v5 = vpop.f32.mrf.mxu0 }
  0x91   :  { %71 = vst [vmem:[#allocation7] sm:$0xff] %v68_v5 }
  0x92   :  { %82 = dma.vmem_to_hbm [thread:$0]  %s78_s1, 128, %s80_s23, [#allocation4]  }
  0x93   :  { %172 = dma.done.wait [#allocation4], 128  }
  0x94   :  { %173 = vsyncadd [#allocation4], 4294967168 }
  0x95   :  { %87 = vsyncpa [#allocation3], 1 }
  0x96   :  { %88 = vsyncpa [#allocation6], 1 }
  0x97   :  { %89 = vsyncpa [#allocation4], 1 }

</bundles_post_ra>
